<compile_context>
chip_gen: v6e
topology: v6e:2x2x1
jax: 0.10.0
libtpu: 0.0.40
codegen_flags: <defaults>
</compile_context>

<pallas_src>
import math
from functools import partial

import jax
import jax.numpy as jnp
from jax.experimental import pallas as pl
from jax.experimental.pallas import tpu as pltpu


_LANE = 128        # last-dim width -> lane-dense, unmasked stores
_ROW_TILE = 8192   # up to (8192, 128) f32 = 4 MiB per block
_MIN_GRID = 4      # aim for >= 4 grid steps so v7x megacore engages

# Giles (2010) single-precision erfinv, w < 5 branch, Horner order
# (highest-degree coefficient first).
_ERFINV_A = (
    2.81022636e-08, 3.43273939e-07, -3.5233877e-06, -4.39150654e-06,
    0.00021858087, -0.00125372503, -0.00417768164, 0.246640727, 1.50140941,
)


def _round_up(a: int, b: int) -> int:
    return -(-a // b) * b


def _counter_to_scaled_gaussian(ctr_u32, seed_u32, coeffs):
    """uint32 counter (+ seed) -> sigma * N(0,1) noise in float32.

    lowbias32 integer mix -> 23 uniform mantissa bits -> v in (-1, 1) ->
    single-branch Giles erfinv (w clamped at 5, i.e. noise truncated at about
    +/-2.9 sigma for ~0.7% of samples).  `coeffs` are the erfinv coefficients
    pre-multiplied by sigma*sqrt(2).  Only jnp/lax ops -> lowers on TPU Mosaic
    and in interpret mode.
    """
    x = ctr_u32 + seed_u32 * jnp.uint32(0x9E3779B9)
    x = x ^ (x >> 16)
    x = x * jnp.uint32(0x7FEB352D)
    x = x ^ (x >> 15)
    x = x * jnp.uint32(0x846CA68B)
    x = x ^ (x >> 16)
    # 23 random mantissa bits -> f in [1, 2); map to v strictly inside (-1, 1).
    m = (x & jnp.uint32(0x007FFFFF)) | jnp.uint32(0x3F800000)
    f = jax.lax.bitcast_convert_type(m, jnp.float32)
    v = 2.0 * (f - 1.5) + jnp.float32(2.0 ** -24)
    w = jnp.minimum(-jnp.log(1.0 - v * v), 5.0) - 2.5
    p = jnp.float32(coeffs[0])
    for c in coeffs[1:]:
        p = p * w + jnp.float32(c)
    return p * v            # = sigma * sqrt(2) * erfinv(v)  ~  N(0, sigma^2)


def _gaussian_noise_kernel(seed_ref, x_ref, o_ref, *, coeffs, block_elems):
    shape = x_ref.shape  # (row_tile, 128)
    base = pl.program_id(0).astype(jnp.uint32) * jnp.uint32(block_elems)
    loc = (jax.lax.broadcasted_iota(jnp.int32, shape, 0) * shape[1]
           + jax.lax.broadcasted_iota(jnp.int32, shape, 1))
    ctr = base + loc.astype(jnp.uint32)          # global flat element index
    noise = _counter_to_scaled_gaussian(ctr, seed_ref[0].astype(jnp.uint32),
                                        coeffs)
    o_ref[...] = (x_ref[...].astype(jnp.float32) + noise).astype(o_ref.dtype)


@partial(jax.jit, static_argnames=("sigma",))
def gaussian_noise(waveform: jax.Array, seed, *, sigma: float = 0.005) -> jax.Array:
    """Add i.i.d. N(0, sigma^2) noise to a floating-point `waveform`.

    Math is done in float32 and cast back to the input dtype; noise is
    truncated at ~+/-2.9 sigma (single-branch erfinv), which is intentional
    and negligible for data augmentation.
    """
    if not jnp.issubdtype(waveform.dtype, jnp.floating):
        raise TypeError("gaussian_noise supports floating-point waveforms only")

    orig_shape = waveform.shape
    orig_dtype = waveform.dtype
    n = waveform.size
    n_main = (n // _LANE) * _LANE               # 128-aligned prefix
    n_tail = n - n_main
    rows = n_main // _LANE

    seed_i32 = jnp.asarray(seed, jnp.int32)
    coeffs = tuple(float(c) * float(sigma) * math.sqrt(2.0) for c in _ERFINV_A)

    x_flat = jnp.ravel(waveform)
    pieces = []

    if rows > 0:
        x2d = x_flat[:n_main].reshape(rows, _LANE)
        # Big tiles to amortize per-step overhead, but split into >= _MIN_GRID
        # steps (when rows allow) so the "parallel" axis feeds both v7x cores.
        row_tile = min(rows, _ROW_TILE,
                       max(8, _round_up(pl.cdiv(rows, _MIN_GRID), 8)))
        grid = (pl.cdiv(rows, row_tile),)
        seed_arr = jnp.reshape(seed_i32, (1,))

        out2d = pl.pallas_call(
            partial(_gaussian_noise_kernel, coeffs=coeffs,
                    block_elems=row_tile * _LANE),
            out_shape=jax.ShapeDtypeStruct((rows, _LANE), x2d.dtype),
            grid=grid,
            in_specs=[
                pl.BlockSpec(memory_space=pltpu.SMEM),               # seed
                pl.BlockSpec((row_tile, _LANE), lambda i: (i, 0)),   # waveform
            ],
            out_specs=pl.BlockSpec((row_tile, _LANE), lambda i: (i, 0)),
            input_output_aliases={1: 0},        # in place, like `waveform +=`
            compiler_params=pltpu.CompilerParams(
                dimension_semantics=("parallel",),
                vmem_limit_bytes=32 * 1024 * 1024),
        )(seed_arr, x2d)
        pieces.append(out2d.reshape(-1))

    if n_tail > 0:
        # <128-element remainder: same counter->hash->erfinv noise, plain JAX.
        ctr_tail = jnp.arange(n_main, n, dtype=jnp.uint32)
        tail_noise = _counter_to_scaled_gaussian(
            ctr_tail, seed_i32.astype(jnp.uint32), coeffs)
        tail_out = (x_flat[n_main:].astype(jnp.float32)
                    + tail_noise).astype(orig_dtype)
        pieces.append(tail_out)

    out_flat = pieces[0] if len(pieces) == 1 else jnp.concatenate(pieces)
    return out_flat.reshape(orig_shape)


if __name__ == "__main__":
    key = jax.random.PRNGKey(0)
    sigma = 0.005

    # Small waveform batch: (batch, channels, freq, time) -> 2048 elements,
    # exercises the Pallas kernel with a 2-step parallel grid.
    B, C, F, T = 2, 4, 16, 16
    x = jax.random.normal(key, (B, C, F, T), dtype=jnp.float32)
    out = jax.block_until_ready(gaussian_noise(x, 1234, sigma=sigma))

    noise = out - x
    assert out.shape == x.shape and out.dtype == x.dtype
    mean = float(jnp.mean(noise))
    std = float(jnp.std(noise))
    amax = float(jnp.max(jnp.abs(noise)))
    assert abs(mean) < 1e-3, f"noise mean too large: {mean}"
    assert 0.8 * sigma < std < 1.2 * sigma, f"noise std off: {std}"
    assert amax < 8.0 * sigma, f"noise magnitude too large: {amax}"

    # Ragged size smaller than one lane row (pure plain-JAX tail path).
    y = jax.random.normal(jax.random.PRNGKey(1), (3, 5, 7), dtype=jnp.float32)
    out2 = jax.block_until_ready(gaussian_noise(y, 42, sigma=sigma))
    n2 = out2 - y
    assert out2.shape == y.shape
    assert float(jnp.std(n2)) > 0.0 and float(jnp.max(jnp.abs(n2))) < 8.0 * sigma

    # Ragged size exercising kernel prefix + tail remainder together.
    z = jax.random.normal(jax.random.PRNGKey(2), (5, 205), dtype=jnp.float32)
    out3 = jax.block_until_ready(gaussian_noise(z, 7, sigma=sigma))
    n3 = out3 - z
    assert out3.shape == z.shape
    assert 0.7 * sigma < float(jnp.std(n3)) < 1.3 * sigma
    assert float(jnp.max(jnp.abs(n3))) < 8.0 * sigma

    print("KERNEL_OK")
</pallas_src>

<mosaic_0001>
module attributes {stable_mosaic.version = 11 : i64} {
  func.func @_gaussian_noise_kernel(%arg0: i32, %arg1: memref<1xi32, #tpu.memory_space<smem>>, %arg2: memref<8x128xf32, #tpu.memory_space<vmem>>, %arg3: memref<8x128xf32, #tpu.memory_space<vmem>>) attributes {dimension_semantics = [#tpu.dimension_semantics<parallel>], iteration_bounds = array<i64: 2>, scalar_prefetch = 0 : i64, scratch_operands = 0 : i64, tpu.core_type = #tpu.core_type<tc>, window_params = [{transform_indices = @transform_0, window_bounds = array<i64: 1>}, {transform_indices = @transform_1, window_bounds = array<i64: 8, 128>}, {transform_indices = @transform_2, window_bounds = array<i64: 8, 128>}]} {
    %c1024_i32 = arith.constant 1024 : i32
    %0 = arith.muli %arg0, %c1024_i32 : i32
    %1 = tpu.iota {dimensions = array<i32: 0>} : vector<8x128xi32>
    %c128_i32 = arith.constant 128 : i32
    %2 = vector.broadcast %c128_i32 : i32 to vector<8x128xi32>
    %3 = arith.muli %1, %2 : vector<8x128xi32>
    %4 = tpu.iota {dimensions = array<i32: 1>} : vector<8x128xi32>
    %5 = arith.addi %3, %4 : vector<8x128xi32>
    %6 = vector.broadcast %0 : i32 to vector<8x128xi32>
    %7 = arith.addi %6, %5 : vector<8x128xi32>
    %c0 = arith.constant 0 : index
    %8 = memref.load %arg1[%c0] : memref<1xi32, #tpu.memory_space<smem>>
    %c-1640531527_i32 = arith.constant -1640531527 : i32
    %9 = arith.muli %8, %c-1640531527_i32 : i32
    %10 = vector.broadcast %9 : i32 to vector<8x128xi32>
    %11 = arith.addi %7, %10 : vector<8x128xi32>
    %c16_i32 = arith.constant 16 : i32
    %12 = vector.broadcast %c16_i32 : i32 to vector<8x128xi32>
    %13 = arith.shrui %11, %12 : vector<8x128xi32>
    %14 = arith.xori %11, %13 : vector<8x128xi32>
    %c2146121005_i32 = arith.constant 2146121005 : i32
    %15 = vector.broadcast %c2146121005_i32 : i32 to vector<8x128xi32>
    %16 = arith.muli %14, %15 : vector<8x128xi32>
    %c15_i32 = arith.constant 15 : i32
    %17 = vector.broadcast %c15_i32 : i32 to vector<8x128xi32>
    %18 = arith.shrui %16, %17 : vector<8x128xi32>
    %19 = arith.xori %16, %18 : vector<8x128xi32>
    %c-2073254261_i32 = arith.constant -2073254261 : i32
    %20 = vector.broadcast %c-2073254261_i32 : i32 to vector<8x128xi32>
    %21 = arith.muli %19, %20 : vector<8x128xi32>
    %c16_i32_0 = arith.constant 16 : i32
    %22 = vector.broadcast %c16_i32_0 : i32 to vector<8x128xi32>
    %23 = arith.shrui %21, %22 : vector<8x128xi32>
    %24 = arith.xori %21, %23 : vector<8x128xi32>
    %c8388607_i32 = arith.constant 8388607 : i32
    %25 = vector.broadcast %c8388607_i32 : i32 to vector<8x128xi32>
    %26 = arith.andi %24, %25 : vector<8x128xi32>
    %c1065353216_i32 = arith.constant 1065353216 : i32
    %27 = vector.broadcast %c1065353216_i32 : i32 to vector<8x128xi32>
    %28 = arith.ori %26, %27 : vector<8x128xi32>
    %29 = tpu.bitcast %28 : vector<8x128xi32> -> vector<8x128xf32>
    %cst = arith.constant 1.500000e+00 : f32
    %30 = vector.broadcast %cst : f32 to vector<8x128xf32>
    %31 = arith.subf %29, %30 : vector<8x128xf32>
    %cst_1 = arith.constant 2.000000e+00 : f32
    %32 = vector.broadcast %cst_1 : f32 to vector<8x128xf32>
    %33 = arith.mulf %32, %31 : vector<8x128xf32>
    %cst_2 = arith.constant 5.96046448E-8 : f32
    %34 = vector.broadcast %cst_2 : f32 to vector<8x128xf32>
    %35 = arith.addf %33, %34 : vector<8x128xf32>
    %36 = arith.mulf %35, %35 : vector<8x128xf32>
    %cst_3 = arith.constant 1.000000e+00 : f32
    %37 = vector.broadcast %cst_3 : f32 to vector<8x128xf32>
    %38 = arith.subf %37, %36 : vector<8x128xf32>
    %39 = math.log %38 : vector<8x128xf32>
    %cst_4 = arith.constant 0.000000e+00 : f32
    %40 = vector.broadcast %cst_4 : f32 to vector<8x128xf32>
    %41 = arith.subf %40, %39 : vector<8x128xf32>
    %cst_5 = arith.constant 5.000000e+00 : f32
    %42 = vector.broadcast %cst_5 : f32 to vector<8x128xf32>
    %43 = arith.minimumf %41, %42 : vector<8x128xf32>
    %cst_6 = arith.constant 2.500000e+00 : f32
    %44 = vector.broadcast %cst_6 : f32 to vector<8x128xf32>
    %45 = arith.subf %43, %44 : vector<8x128xf32>
    %cst_7 = arith.constant 1.98713018E-10 : f32
    %46 = vector.broadcast %cst_7 : f32 to vector<8x128xf32>
    %47 = arith.mulf %46, %45 : vector<8x128xf32>
    %cst_8 = arith.constant 2.42731324E-9 : f32
    %48 = vector.broadcast %cst_8 : f32 to vector<8x128xf32>
    %49 = arith.addf %47, %48 : vector<8x128xf32>
    %50 = arith.mulf %49, %45 : vector<8x128xf32>
    %cst_9 = arith.constant -2.49141134E-8 : f32
    %51 = vector.broadcast %cst_9 : f32 to vector<8x128xf32>
    %52 = arith.addf %50, %51 : vector<8x128xf32>
    %53 = arith.mulf %52, %45 : vector<8x128xf32>
    %cst_10 = arith.constant -3.10526396E-8 : f32
    %54 = vector.broadcast %cst_10 : f32 to vector<8x128xf32>
    %55 = arith.addf %53, %54 : vector<8x128xf32>
    %56 = arith.mulf %55, %45 : vector<8x128xf32>
    %cst_11 = arith.constant 1.54560018E-6 : f32
    %57 = vector.broadcast %cst_11 : f32 to vector<8x128xf32>
    %58 = arith.addf %56, %57 : vector<8x128xf32>
    %59 = arith.mulf %58, %45 : vector<8x128xf32>
    %cst_12 = arith.constant -8.865175E-6 : f32
    %60 = vector.broadcast %cst_12 : f32 to vector<8x128xf32>
    %61 = arith.addf %59, %60 : vector<8x128xf32>
    %62 = arith.mulf %61, %45 : vector<8x128xf32>
    %cst_13 = arith.constant -2.95406699E-5 : f32
    %63 = vector.broadcast %cst_13 : f32 to vector<8x128xf32>
    %64 = arith.addf %62, %63 : vector<8x128xf32>
    %65 = arith.mulf %64, %45 : vector<8x128xf32>
    %cst_14 = arith.constant 0.00174401328 : f32
    %66 = vector.broadcast %cst_14 : f32 to vector<8x128xf32>
    %67 = arith.addf %65, %66 : vector<8x128xf32>
    %68 = arith.mulf %67, %45 : vector<8x128xf32>
    %cst_15 = arith.constant 0.0106165679 : f32
    %69 = vector.broadcast %cst_15 : f32 to vector<8x128xf32>
    %70 = arith.addf %68, %69 : vector<8x128xf32>
    %71 = arith.mulf %70, %35 : vector<8x128xf32>
    %c0_16 = arith.constant 0 : index
    %c0_17 = arith.constant 0 : index
    %72 = vector.load %arg2[%c0_16, %c0_17] : memref<8x128xf32, #tpu.memory_space<vmem>>, vector<8x128xf32>
    %73 = arith.addf %72, %71 : vector<8x128xf32>
    %c0_18 = arith.constant 0 : index
    %c0_19 = arith.constant 0 : index
    %74 = vector.load %arg3[%c0_18, %c0_19] : memref<8x128xf32, #tpu.memory_space<vmem>>, vector<8x128xf32>
    tpu.vector_store %arg3[%c0_18, %c0_19], %73 {strides = array<i32>} : memref<8x128xf32, #tpu.memory_space<vmem>>, vector<8x128xf32>,
    return
  }
  func.func @transform_0(%arg0: i32) -> i32 {
    %c0_i32 = arith.constant 0 : i32
    %c0_i32_0 = arith.constant 0 : i32
    return %c0_i32 : i32
  }
  func.func @transform_1(%arg0: i32) -> (i32, i32) {
    %c0_i32 = arith.constant 0 : i32
    %c0_i32_0 = arith.constant 0 : i32
    return %arg0, %c0_i32 : i32, i32
  }
  func.func @transform_2(%arg0: i32) -> (i32, i32) {
    %c0_i32 = arith.constant 0 : i32
    %c0_i32_0 = arith.constant 0 : i32
    return %arg0, %c0_i32 : i32, i32
  }
}

</mosaic_0001>

<bundles_post_ra>
// kernel: gaussian_noise.1
= control target key start
LH: loop header
LB: loop body
LE: loop exit
PB: predicated region body
PF: predicated region fallthrough
CT: control target
= control target key end

     0   :  { %s295_s11 = smov 0   ;;  %s317_s0 = inlined_call_operand.<no memory space> [shape: s32[1], index: 0, kind: input, shape index: {}]   ;;  %s318_s1 = inlined_call_operand.vmem [shape: f32[16,128], index: 1, kind: input, shape index: {}, may-alias: {1,2}]   ;;  %s319_s2 = inlined_call_operand.vmem [shape: f32[16,128], index: 2, kind: output, shape index: {}, may-alias: {1,2}]  }
   0x1   :  { %7 = sst [smem:[#allocation2]] %s317_s0 }
   0x2 LB: > { %s301_s12 = sadd.s32 4294967295, %s275_s11   ;;  %p251_p0 = scmp.ge.s32.totalorder %s275_s11, 1  ;;  %s275_s11 = sphi %s295_s11, %s13_s11  }
   0x3   : > { %p112_p1 = scmp.lt.s32.totalorder %s275_s11, 3 }
   0x5   : > { %p113_p2 = pnand %p251_p0, %p112_p1 }
   0x6   : > { %s149_s13 = sld [smem:[#allocation2]] (!%p113_p2)  ;;  %s254_s0 = sshll.u32 (!%p113_p2), %s301_s12, 10 }
   0x7   : > { %116 = sbr.rel (%p113_p2) target bundleno = 113 (0x71), region = 28  ;;  %p132_p3 = scmp.lt.s32.totalorder (!%p113_p2), %s301_s12, 1 }
   0xc   : > { %v141_v0 = vlaneseq  ;;  %v147_v4 = vstv %s254_s0  ;;  %s150_s14 = smul.u32 2654435769, %s149_s13  ;;  %s321_s12 = smov (!%p132_p3, %s301_s12), 1 }
   0xd   : > { %s252_s15 = sshll.u32 %s321_s12, 3 }
   0xe   : > { %v142_v1 = vshrl.u32 %v141_v0, 7  ;;  %v145_v2 = vand.u32 127, %v141_v0  ;;  %v151_v7 = vstv %s150_s14  ;;  %s135_s18 = scalar_lea.vmem %s318_s1, %s252_s15  ;;  %s139_s21 = scalar_lea.vmem %s319_s2, %s252_s15 }
   0xf   : > { %v191_v45 = vld [vmem:[%s135_s18] sm:$0xff] }
  0x10   : > { %v143_v3 = vmul.u32 128, %v142_v1 }
  0x12   : > { %v146_v5 = vadd.s32 %v145_v2, %v143_v3 }
  0x14   : > { %v148_v6 = vadd.s32 %v147_v4, %v146_v5 }
  0x16   : > { %v152_v8 = vadd.s32 %v151_v7, %v148_v6 }
  0x18   : > { %v153_v9 = vshrl.u32 %v152_v8, 16 }
  0x1a   : > { %v154_v10 = vxor.u32 %v153_v9, %v152_v8 }
  0x1c   : > { %v155_v11 = vmul.u32 2146121005, %v154_v10 }
  0x1e   : > { %v156_v12 = vshrl.u32 %v155_v11, 15 }
  0x20   : > { %v157_v13 = vxor.u32 %v156_v12, %v155_v11 }
  0x22   : > { %v158_v14 = vmul.u32 2221713035, %v157_v13 }
  0x24   : > { %v159_v15 = vshrl.u32 %v158_v14, 16 }
  0x26   : > { %v160_v16 = vxor.u32 %v159_v15, %v158_v14 }
  0x28   : > { %v161_v17 = vand.u32 8388607, %v160_v16 }
  0x2a   : > { %v162_v18 = vor.u32 1065353216, %v161_v17 }
  0x2c   : > { %v255_v19 = vadd.f32 -1.5, %v162_v18 }
  0x2e   : > { %v165_v20 = vmul.f32 2.0, %v255_v19 }
  0x30   : > { %v166_v21 = vadd.f32 5.9604645e-08, %v165_v20 }
  0x32   : > { %v167_v22 = vmul.f32 %v166_v21, %v166_v21 }
  0x34   : > { %v168_v23 = vsub.f32 1.0, %v167_v22 }
  0x36   : > { %267 = vlog2.f32 %v168_v23 }
  0x43   : > { %v268_v24 = vpop.eup %267 }
  0x44   : > { %v170_v25 = vmul.f32 0.6931472, %v268_v24 }
  0x46   : > { %v171_v26 = vsub.f32 0.0, %v170_v25 }
  0x48   : > { %v172_v27 = vmin.f32 %v171_v26, 5.0 }
  0x4a   : > { %v256_v28 = vadd.f32 -2.5, %v172_v27 }
  0x4c   : > { %v174_v29 = vmul.f32 1.9871302e-10, %v256_v28 }
  0x4e   : > { %v175_v30 = vadd.f32 2.4273132e-09, %v174_v29 }
  0x50   : > { %v176_v31 = vmul.f32 %v256_v28, %v175_v30 }
  0x52   : > { %v177_v32 = vadd.f32 -2.4914113e-08, %v176_v31 }
  0x54   : > { %v178_v33 = vmul.f32 %v256_v28, %v177_v32 }
  0x56   : > { %v179_v34 = vadd.f32 -3.105264e-08, %v178_v33 }
  0x58   : > { %v180_v35 = vmul.f32 %v256_v28, %v179_v34 }
  0x5a   : > { %v181_v36 = vadd.f32 1.5456002e-06, %v180_v35 }
  0x5c   : > { %v182_v37 = vmul.f32 %v256_v28, %v181_v36 }
  0x5e   : > { %v183_v38 = vadd.f32 -8.865175e-06, %v182_v37 }
  0x60   : > { %v184_v39 = vmul.f32 %v256_v28, %v183_v38 }
  0x62   : > { %v185_v40 = vadd.f32 -2.954067e-05, %v184_v39 }
  0x64   : > { %v186_v41 = vmul.f32 %v256_v28, %v185_v40 }
  0x66   : > { %v187_v42 = vadd.f32 0.0017440133, %v186_v41 }
  0x68   : > { %v188_v43 = vmul.f32 %v256_v28, %v187_v42 }
  0x6a   : > { %v189_v44 = vadd.f32 0.010616568, %v188_v43 }
  0x6c   : > { %v190_v46 = vmul.f32 %v189_v44, %v166_v21 }
  0x6e   : > { %v192_v47 = vadd.f32 %v191_v45, %v190_v46 }
  0x70   : > { %193 = vst [vmem:[%s139_s21] sm:$0xff] %v192_v47 }
  0x71 PF: > { %s13_s11 = sadd.s32 1, %s275_s11  }
  0x72   : > { %p10_p4 = scmp.ge.s32.totalorder %s13_s11, 4  }
  0x74   :  { %12 = sbr.rel (!%p10_p4) target bundleno = 2 (0x2), region = 58 }

</bundles_post_ra>
